<compile_context>
chip_gen: v5e
topology: v5e:2x2
jax: 0.10.0
libtpu: 0.0.40
codegen_flags: <defaults>
</compile_context>

<pallas_src>
import functools

import jax
import jax.numpy as jnp
from jax import lax
from jax.experimental import pallas as pl
from jax.experimental.pallas import tpu as pltpu


_TARGET_BLOCK_F32_BYTES = 2 * 1024 * 1024  # per-buffer input tile target (f32-equivalent)


def _sum_zero_colsum_kernel(pred_ref, out_ref, acc_ref, *, n_total, tile_n, tile_d,
                            mask_rows):
    """Accumulate column sums over the row-tiled (inner) grid axis.

    grid = (D_chunks, N_chunks).  acc_ref is a (1, tile_d) f32 VMEM accumulator that is
    re-initialized at the first row step of every feature chunk and flushed (lane-dense)
    to the output block on the last row step.
    """
    n_idx = pl.program_id(1)

    @pl.when(n_idx == 0)
    def _():
        acc_ref[...] = jnp.zeros_like(acc_ref)

    # Cast in-kernel so HBM traffic stays in the input's native (possibly narrow) dtype.
    x = pred_ref[...].astype(jnp.float32)

    if mask_rows:  # statically enabled only when N % tile_n != 0 (ragged last row tile)
        row_ids = lax.broadcasted_iota(jnp.int32, (tile_n, tile_d), 0)
        x = jnp.where(row_ids + n_idx * tile_n < n_total, x, 0.0)

    acc_ref[...] += jnp.sum(x, axis=0, keepdims=True)

    @pl.when(n_idx == pl.num_programs(1) - 1)
    def _():
        # Lane-dense (1, tile_d) store; columns past D in the last feature chunk are
        # clipped by the block writeback, so no column masking is needed.
        out_ref[...] = acc_ref[...]


def sum_zero_loss(pred, target=None, *, tile_n=None, tile_d=1024):
    """loss = sqrt( sum_d ( sum_n pred[n, d] )^2 ).  `target` is ignored (as in PyTorch)."""
    del target
    assert pred.ndim == 2, "sum_zero_loss expects a 2-D (N, D) input"
    N, D = pred.shape

    itemsize = jnp.dtype(pred.dtype).itemsize
    # Sublane packing for the second-to-last block dim: f32 -> 8, bf16 -> 16, int8/fp8 -> 32.
    pack = 8 * max(1, 4 // itemsize)

    # ---- feature (lane) tile: full D, or a multiple of 128 -------------------------
    td = int(min(tile_d, D))
    if td < D:
        td = max(128, (td // 128) * 128)

    # ---- row tile: big enough to amortize the ~0.35 us per-grid-step overhead ------
    if tile_n is None:
        tile_n = max(pack, _TARGET_BLOCK_F32_BYTES // (td * 4))
    tn = int(min(tile_n, N))
    if tn < N and tn % pack != 0:  # partial blocks need the packing-aligned sublane dim
        tn = max(pack, (tn // pack) * pack)

    grid_d = pl.cdiv(D, td)
    grid_n = pl.cdiv(N, tn)
    mask_rows = (N % tn) != 0  # padded rows of the ragged last row tile must be zeroed

    kernel = functools.partial(
        _sum_zero_colsum_kernel,
        n_total=N, tile_n=tn, tile_d=td, mask_rows=mask_rows)

    col_sums = pl.pallas_call(
        kernel,
        out_shape=jax.ShapeDtypeStruct((1, D), jnp.float32),
        grid_spec=pltpu.PrefetchScalarGridSpec(
            num_scalar_prefetch=0,
            grid=(grid_d, grid_n),  # D chunks outer (parallel), N chunks inner (reduction)
            in_specs=[pl.BlockSpec((tn, td), lambda d, n: (n, d))],
            out_specs=pl.BlockSpec((1, td), lambda d, n: (0, d)),
            scratch_shapes=[pltpu.VMEM((1, td), jnp.float32)],
        ),
        compiler_params=pltpu.CompilerParams(
            # Feature chunks are independent -> shardable across both v7x TensorCores;
            # the row axis is the carried reduction.
            dimension_semantics=("parallel", "arbitrary"),
        ),
    )(pred)

    # Tiny O(D) epilogue in XLA (kept out of the kernel so the D grid axis stays "parallel").
    return jnp.sqrt(jnp.sum(jnp.square(col_sums)))


if __name__ == "__main__":
    key = jax.random.PRNGKey(0)
    k1, k2, k3 = jax.random.split(key, 3)

    # Case 1: small f32 input (single tile, full dims), target provided but unused.
    N1, D1 = 40, 128
    pred1 = jax.random.normal(k1, (N1, D1), dtype=jnp.float32)
    target1 = jax.random.normal(k2, (N1, D1), dtype=jnp.float32)  # unused, as in PyTorch
    loss1 = jax.block_until_ready(sum_zero_loss(pred1, target1))
    ref1 = jnp.sqrt(jnp.sum(jnp.sum(pred1, axis=0) ** 2, axis=-1))
    assert jnp.allclose(loss1, ref1, rtol=1e-5, atol=1e-5), (loss1, ref1)

    # Case 2: bf16 input with ragged row/column tiles (exercises native-dtype DMA,
    # in-kernel f32 cast, multi-chunk D axis, and last-row-tile masking).
    N2, D2 = 300, 384
    pred2 = jax.random.normal(k3, (N2, D2), dtype=jnp.float32).astype(jnp.bfloat16)
    loss2 = jax.block_until_ready(sum_zero_loss(pred2, None, tile_n=128, tile_d=256))
    ref2 = jnp.sqrt(jnp.sum(jnp.sum(pred2.astype(jnp.float32), axis=0) ** 2, axis=-1))
    assert jnp.allclose(loss2, ref2, rtol=1e-4, atol=1e-4), (loss2, ref2)

    print("KERNEL_OK")
</pallas_src>

<mosaic_0001>
module attributes {stable_mosaic.version = 11 : i64} {
  func.func @_sum_zero_colsum_kernel(%arg0: i32, %arg1: i32, %arg2: memref<40x128xf32, #tpu.memory_space<vmem>>, %arg3: memref<1x128xf32, #tpu.memory_space<vmem>>, %arg4: memref<1x128xf32, #tpu.memory_space<vmem>>) attributes {dimension_semantics = [#tpu.dimension_semantics<parallel>, #tpu.dimension_semantics<arbitrary>], iteration_bounds = array<i64: 1, 1>, scalar_prefetch = 0 : i64, scratch_operands = 1 : i64, tpu.core_type = #tpu.core_type<tc>, window_params = [{transform_indices = @transform_0, window_bounds = array<i64: 40, 128>}, {transform_indices = @transform_1, window_bounds = array<i64: 1, 128>}]} {
    %c0_i32 = arith.constant 0 : i32
    %0 = arith.cmpi eq, %arg1, %c0_i32 : i32
    %1 = arith.extui %0 : i1 to i32
    %c0_i32_0 = arith.constant 0 : i32
    %2 = arith.cmpi ne, %1, %c0_i32_0 : i32
    scf.if %2 {
      %cst_8 = arith.constant 0.000000e+00 : f32
      %12 = vector.broadcast %cst_8 : f32 to vector<1x128xf32>
      %c0_9 = arith.constant 0 : index
      %c0_10 = arith.constant 0 : index
      %13 = vector.load %arg4[%c0_9, %c0_10] : memref<1x128xf32, #tpu.memory_space<vmem>>, vector<1x128xf32>
      tpu.vector_store %arg4[%c0_9, %c0_10], %12 {strides = array<i32>} : memref<1x128xf32, #tpu.memory_space<vmem>>, vector<1x128xf32>,
    } else {
    }
    %c0 = arith.constant 0 : index
    %c0_1 = arith.constant 0 : index
    %3 = vector.load %arg2[%c0, %c0_1] : memref<40x128xf32, #tpu.memory_space<vmem>>, vector<40x128xf32>
    %c0_2 = arith.constant 0 : index
    %c0_3 = arith.constant 0 : index
    %4 = vector.load %arg4[%c0_2, %c0_3] : memref<1x128xf32, #tpu.memory_space<vmem>>, vector<1x128xf32>
    %cst = arith.constant dense<0.000000e+00> : vector<128xf32>
    %5 = vector.multi_reduction <add>, %3, %cst [0] : vector<40x128xf32> to vector<128xf32>
    %6 = vector.shape_cast %5 : vector<128xf32> to vector<1x128xf32>
    %7 = arith.addf %4, %6 : vector<1x128xf32>
    %c0_4 = arith.constant 0 : index
    %c0_5 = arith.constant 0 : index
    %8 = vector.load %arg4[%c0_4, %c0_5] : memref<1x128xf32, #tpu.memory_space<vmem>>, vector<1x128xf32>
    tpu.vector_store %arg4[%c0_4, %c0_5], %7 {strides = array<i32>} : memref<1x128xf32, #tpu.memory_space<vmem>>, vector<1x128xf32>,
    %c0_i32_6 = arith.constant 0 : i32
    %9 = arith.cmpi eq, %arg1, %c0_i32_6 : i32
    %10 = arith.extui %9 : i1 to i32
    %c0_i32_7 = arith.constant 0 : i32
    %11 = arith.cmpi ne, %10, %c0_i32_7 : i32
    scf.if %11 {
      %c0_8 = arith.constant 0 : index
      %c0_9 = arith.constant 0 : index
      %12 = vector.load %arg4[%c0_8, %c0_9] : memref<1x128xf32, #tpu.memory_space<vmem>>, vector<1x128xf32>
      %c0_10 = arith.constant 0 : index
      %c0_11 = arith.constant 0 : index
      %13 = vector.load %arg3[%c0_10, %c0_11] : memref<1x128xf32, #tpu.memory_space<vmem>>, vector<1x128xf32>
      tpu.vector_store %arg3[%c0_10, %c0_11], %12 {strides = array<i32>} : memref<1x128xf32, #tpu.memory_space<vmem>>, vector<1x128xf32>,
    } else {
    }
    return
  }
  func.func @transform_0(%arg0: i32, %arg1: i32) -> (i32, i32) {
    %c0_i32 = arith.constant 0 : i32
    return %arg1, %arg0 : i32, i32
  }
  func.func @transform_1(%arg0: i32, %arg1: i32) -> (i32, i32) {
    %c0_i32 = arith.constant 0 : i32
    %c0_i32_0 = arith.constant 0 : i32
    return %c0_i32, %arg0 : i32, i32
  }
}

</mosaic_0001>

<bundles_post_ra>
// kernel: tpu_custom_call.1
= control target key start
LH: loop header
LB: loop body
LE: loop exit
PB: predicated region body
PF: predicated region fallthrough
CT: control target
= control target key end

     0   :  { %6 = vsyncpa [#allocation4], 0  ;;  %s148_s0 = inlined_call_operand.hbm [shape: f32[40,128], index: 0, kind: input, shape index: {}]   ;;  %s149_s1 = inlined_call_operand.hbm [shape: f32[1,128], index: 1, kind: output, shape index: {}]  }
   0x1   :  { %7 = vsyncpa [#allocation5], 0  ;;  %s12_s8 = sshll.u32 %s148_s0, 4  ;;  %s127_s9 = smov [#allocation3]   ;;  %s13_s8 = int_to_ptr.hbm [resolvable:$true] %s12_s8 }
   0x2   :  { %s14_s10 = sshll.u32 %s127_s9, 4  ;;  %s128_s11 = smov 128   ;;  %s15_s10 = int_to_ptr.vmem [resolvable:$true] %s14_s10 }
   0x3   :  { %s129_s12 = smov 8  }
   0x4   :  { %20 = dma.hbm_to_vmem [thread:$0]  %s13_s8, 640, %s15_s10, [#allocation4], %s128_s11, %s128_s11, %s129_s12  }
   0x5   :  { %123 = dma.done.wait [#allocation4], 640  }
   0x6   :  { %124 = vsyncadd [#allocation4], 4294966656  ;;  %v130_v0 = vmov 0.0   ;;  %v30_v1 = vld [vmem:[#allocation3] sm:$0xff]  ;;  %v31_v2 = vld [vmem:[#allocation3 + $0x8] sm:$0xff]  ;;  %s131_s0 = smov [#allocation6]  }
   0x7   :  { %29 = vst [vmem:[#allocation2] sm:$0x1] %v130_v0  ;;  %v32_v3 = vld [vmem:[#allocation3 + $0x10] sm:$0xff]  ;;  %v36_v4 = vadd.f32 %v31_v2, %v30_v1  ;;  %v33_v5 = vld [vmem:[#allocation3 + $0x18] sm:$0xff]  ;;  %v34_v7 = vld [vmem:[#allocation3 + $0x20] sm:$0xff]  ;;  %s58_s13 = sshll.u32 %s131_s0, 4  ;;  %s59_s13 = int_to_ptr.vmem [resolvable:$true] %s58_s13 }
   0x8   :  { %s60_s16 = sshll.u32 %s149_s1, 4  ;;  %s61_s16 = int_to_ptr.hbm [resolvable:$true] %s60_s16 }
   0x9   :  { %v37_v6 = vadd.f32 %v36_v4, %v32_v3 }
   0xb   :  { %v38_v8 = vadd.f32 %v37_v6, %v33_v5 }
   0xd   :  { %v39_v9 = vadd.f32 %v38_v8, %v34_v7 }
   0xe   :  { %v35_v15 = vld [vmem:[#allocation2] sm:$0x1] }
   0xf   :  { %v40_v10 = vrot.slane %v39_v9, 4 }
  0x11   :  { %v41_v11 = vadd.f32 %v40_v10, %v39_v9 }
  0x13   :  { %v42_v12 = vrot.slane %v41_v11, 2 }
  0x15   :  { %v43_v13 = vadd.f32 %v42_v12, %v41_v11 }
  0x17   :  { %v44_v14 = vrot.slane %v43_v13, 1 }
  0x19   :  { %v45_v16 = vadd.f32 %v44_v14, %v43_v13 }
  0x1b   :  { %v46_v17 = vadd.f32 %v45_v16, %v35_v15 }
  0x1d   :  { %47 = vst [vmem:[#allocation2] sm:$0x1] %v46_v17 }
  0x24   :  { %v51_v18 = vld [vmem:[#allocation2] sm:$0x1] }
  0x25   :  { %52 = vst [vmem:[#allocation6] sm:$0x1] %v51_v18 }
  0x26   :  { %63 = dma.vmem_to_hbm [thread:$0]  %s59_s13, 16, %s61_s16, [#allocation5]  }
  0x27   :  { %125 = dma.done.wait [#allocation5], 16  }
  0x28   :  { %126 = vsyncadd [#allocation5], 4294967280 }
  0x29   :  { %68 = vsyncpa [#allocation4], 1 }
  0x2a   :  { %69 = vsyncpa [#allocation5], 1 }

</bundles_post_ra>
